<compile_context>
chip_gen: v7x
topology: tpu7x:2x2x1
jax: 0.10.0
libtpu: 0.0.40
codegen_flags: <defaults>
</compile_context>

<pallas_src>
import functools

import jax
import jax.numpy as jnp
from jax.experimental import pallas as pl
from jax.experimental.pallas import tpu as pltpu


def _round_up(x, m):
    return ((x + m - 1) // m) * m


def _vmem_limit_bytes():
    """~85% of physical VMEM (generation-aware); conservative fallback."""
    try:
        cap = pltpu.get_tpu_info().vmem_capacity_bytes
    except Exception:
        cap = 64 * 1024 * 1024
    return int(cap * 0.85)


def _choose_tiles(B, N):
    """Pick (batch-tile, agent-tile).

    Goals: >=4 total grid steps when the problem allows (2 per v7x TensorCore,
    >=3 pipeline steps on single-TC v5e/v6e), agent tiles in multiples of 16
    (bf16 packs two rows per sublane), ~512 rows per step.
    """
    if N <= 16:
        tn = N                      # full-dim block -> satisfies the (8,128) rule
    else:
        # If B alone can't provide >=4 grid steps, split N into >=4/B pieces.
        target_n = N if B >= 4 else pl.cdiv(N, max(1, 4 // B))
        tn = min(512, max(16, (min(target_n, 512) // 16) * 16))
    n_steps = pl.cdiv(N, tn)
    tb = max(1, min(B, max(1, 512 // max(tn, 1))))
    while tb > 1 and pl.cdiv(B, tb) * n_steps < 4:
        tb = max(1, tb // 2)
    return tb, tn


def _actor_head_kernel(action_dim,
                       ref_ref, gb_ref,
                       w1a_ref, w2_ref, b2_ref,
                       wh_ref, bh_ref,
                       out_ref):
    tb, tn, rsa = ref_ref.shape
    rows = tb * tn

    # Layer 1: refined part on the MXU (bf16 operands, f32 accumulate); the
    # per-batch global-context part (already folded with b1) is added with a
    # broadcast over the agent (tn) axis — no per-row bias stream from HBM.
    x = ref_ref[...].reshape(rows, rsa).astype(w1a_ref.dtype)
    h1 = jnp.dot(x, w1a_ref[...], preferred_element_type=jnp.float32)
    h1 = h1.reshape(tb, tn, h1.shape[-1]) + gb_ref[...]      # (tb,1,H1p) broadcast
    h1 = jnp.maximum(h1, 0.0).reshape(rows, -1)

    # Layer 2.
    h2 = jnp.dot(h1.astype(w2_ref.dtype), w2_ref[...],
                 preferred_element_type=jnp.float32)
    h2 = jnp.maximum(h2 + b2_ref[...], 0.0)

    # Fused, lane-padded policy heads: lanes [0:A) = mu, [A:2A) = raw log_std,
    # remaining lanes are zero padding (sliced away before the store).
    raw = jnp.dot(h2.astype(wh_ref.dtype), wh_ref[...],
                  preferred_element_type=jnp.float32) + bh_ref[...]
    lane = jax.lax.broadcasted_iota(jnp.int32, raw.shape, 1)
    packed = jnp.where(lane < action_dim, raw, jnp.clip(raw, -20.0, 2.0))

    # Narrow (tb, tn, 2A) store: HBM write bandwidth (not the store slot) is
    # the bottleneck here, so writing only the useful lanes wins on all gens.
    # Rows beyond B/N bounds in edge tiles are garbage but are masked by Pallas
    # on writeback; there is no cross-row mixing, so this is benign.
    out_ref[...] = packed[:, :2 * action_dim].reshape(tb, tn, 2 * action_dim)


def prepare_params(params, rsa_output_dim):
    """One-time weight preprocessing (pad / fuse heads / bf16 cast).

    Returns (prepared_pytree, action_dim). Run once, outside the jitted
    forward, so the padding/cast HBM passes are amortized across calls.
    """
    w1, b1 = params["w1"], params["b1"]          # (2*rsa, H1), (H1,)
    w2, b2 = params["w2"], params["b2"]          # (H1, H2), (H2,)
    wmu, bmu = params["wmu"], params["bmu"]      # (H2, A), (A,)
    wsig, bsig = params["wsig"], params["bsig"]  # (H2, A), (A,)

    H1, H2, A = w1.shape[1], w2.shape[1], wmu.shape[1]
    H1p = _round_up(H1, 128)
    H2p = _round_up(H2, 128)
    OUTp = _round_up(max(2 * A, 128), 128)

    # Split W1: joint @ W1 == refined @ W1a + global @ W1b   (concat fused away).
    w1a = jnp.pad(w1[:rsa_output_dim], ((0, 0), (0, H1p - H1))).astype(jnp.bfloat16)
    # Global part stays f32: computed once per batch element in the wrapper.
    w1b = jnp.pad(w1[rsa_output_dim:], ((0, 0), (0, H1p - H1))).astype(jnp.float32)
    b1p = jnp.pad(b1, (0, H1p - H1)).astype(jnp.float32)

    w2p = jnp.pad(w2, ((0, H1p - H1), (0, H2p - H2))).astype(jnp.bfloat16)
    b2p = jnp.pad(b2, (0, H2p - H2)).astype(jnp.float32).reshape(1, H2p)

    wh = jnp.zeros((H2p, OUTp), jnp.float32)
    wh = wh.at[:H2, :A].set(wmu.astype(jnp.float32))
    wh = wh.at[:H2, A:2 * A].set(wsig.astype(jnp.float32))
    bh = jnp.zeros((OUTp,), jnp.float32).at[:A].set(bmu).at[A:2 * A].set(bsig)

    prepared = {
        "w1a": w1a, "w1b": w1b, "b1": b1p,
        "w2": w2p, "b2": b2p,
        "wh": wh.astype(jnp.bfloat16), "bh": bh.reshape(1, OUTp),
    }
    return prepared, int(A)


@functools.partial(jax.jit, static_argnames=("action_dim",))
def actor_head_forward(refined_embeddings, global_context, prepared, action_dim):
    """refined_embeddings: (B, N, 2D), global_context: (B, 2D) -> dict of (B, N, A)."""
    B, N, rsa = refined_embeddings.shape
    A = action_dim

    w1a, w1b, b1 = prepared["w1a"], prepared["w1b"], prepared["b1"]
    w2, b2 = prepared["w2"], prepared["b2"]
    wh, bh = prepared["wh"], prepared["bh"]
    H1p, H2p, OUTp = w1a.shape[1], w2.shape[1], wh.shape[1]

    # Per-batch global-context contribution to layer 1 (includes b1), f32.
    glob_bias = (global_context.astype(jnp.float32) @ w1b + b1).reshape(B, 1, H1p)

    tb, tn = _choose_tiles(B, N)
    grid = (pl.cdiv(B, tb), pl.cdiv(N, tn))

    # Resident weights: if large, single-buffer them (they are only fetched
    # once; default double buffering would waste VMEM, which matters on v7x).
    weight_bytes = (w1a.size + w2.size + wh.size) * 2 + (b2.size + bh.size) * 4
    w_kwargs = {"pipeline_mode": pl.Buffered(1)} if weight_bytes > 8 * 1024 * 1024 else {}

    def w_spec(shape):
        return pl.BlockSpec(shape, lambda b, j: (0,) * len(shape), **w_kwargs)

    cost = pl.CostEstimate(
        flops=2 * B * N * (rsa * H1p + H1p * H2p + H2p * OUTp),
        transcendentals=0,
        bytes_accessed=int(refined_embeddings.size * refined_embeddings.dtype.itemsize
                           + glob_bias.size * 4
                           + weight_bytes
                           + B * N * 2 * A * 4),
    )

    packed = pl.pallas_call(
        functools.partial(_actor_head_kernel, A),
        out_shape=jax.ShapeDtypeStruct((B, N, 2 * A), jnp.float32),
        grid_spec=pltpu.PrefetchScalarGridSpec(
            num_scalar_prefetch=0,
            grid=grid,
            in_specs=[
                pl.BlockSpec((tb, tn, rsa), lambda b, j: (b, j, 0)),   # refined rows
                pl.BlockSpec((tb, 1, H1p), lambda b, j: (b, 0, 0)),    # per-batch bias
                w_spec((rsa, H1p)),      # W1a
                w_spec((H1p, H2p)),      # W2
                w_spec((1, H2p)),        # b2
                w_spec((H2p, OUTp)),     # fused head weights
                w_spec((1, OUTp)),       # fused head biases
            ],
            out_specs=pl.BlockSpec((tb, tn, 2 * A), lambda b, j: (b, j, 0)),
        ),
        compiler_params=pltpu.CompilerParams(
            dimension_semantics=("parallel", "parallel"),
            vmem_limit_bytes=_vmem_limit_bytes()),
        cost_estimate=cost,
    )(refined_embeddings, glob_bias, w1a, w2, b2, wh, bh)

    means = packed[..., :A]
    log_stds = packed[..., A:2 * A]
    return {"means": means, "log_stds": log_stds, "stds": jnp.exp(log_stds)}


def init_params(key, rsa_output_dim, hidden_sizes, action_dim):
    """Deterministic synthetic parameter init (mirrors module __init__ shapes)."""
    input_dim = 2 * rsa_output_dim
    h1, h2 = hidden_sizes
    k1, k2, k3, k4 = jax.random.split(key, 4)
    return {
        "w1": jax.random.normal(k1, (input_dim, h1), jnp.float32) / jnp.sqrt(input_dim),
        "b1": jnp.zeros((h1,), jnp.float32),
        "w2": jax.random.normal(k2, (h1, h2), jnp.float32) / jnp.sqrt(h1),
        "b2": jnp.zeros((h2,), jnp.float32),
        "wmu": 0.01 * jax.random.normal(k3, (h2, action_dim), jnp.float32),
        "bmu": jnp.zeros((action_dim,), jnp.float32),
        "wsig": 0.01 * jax.random.normal(k4, (h2, action_dim), jnp.float32),
        "bsig": jnp.full((action_dim,), -0.5, jnp.float32),
    }


def _reference_forward(refined, global_ctx, params):
    """Pure-JAX f32 reference for correctness check."""
    B, N, D2 = refined.shape
    glob = jnp.broadcast_to(global_ctx[:, None, :], (B, N, D2))
    joint = jnp.concatenate([refined, glob], axis=-1).reshape(B * N, -1)
    h = jnp.maximum(joint @ params["w1"] + params["b1"], 0.0)
    h = jnp.maximum(h @ params["w2"] + params["b2"], 0.0)
    mu = h @ params["wmu"] + params["bmu"]
    ls = jnp.clip(h @ params["wsig"] + params["bsig"], -20.0, 2.0)
    A = mu.shape[-1]
    return {
        "means": mu.reshape(B, N, A),
        "log_stds": ls.reshape(B, N, A),
        "stds": jnp.exp(ls).reshape(B, N, A),
    }


if __name__ == "__main__":
    # Small shapes consistent with the module's forward signature.
    B, N = 2, 8
    rsa_output_dim = 32          # "2D" feature width per the module docstring
    hidden_sizes = [128, 64]
    action_dim = 2

    key = jax.random.PRNGKey(0)
    kp, kr, kg = jax.random.split(key, 3)

    params = init_params(kp, rsa_output_dim, hidden_sizes, action_dim)
    refined = jax.random.normal(kr, (B, N, rsa_output_dim), jnp.float32)
    global_ctx = jax.random.normal(kg, (B, rsa_output_dim), jnp.float32)

    prepared, A = prepare_params(params, rsa_output_dim)
    out = actor_head_forward(refined, global_ctx, prepared, A)
    jax.block_until_ready(out)

    ref = _reference_forward(refined, global_ctx, params)
    for k in ("means", "log_stds", "stds"):
        assert out[k].shape == (B, N, action_dim), k
        # bf16 MXU operands (f32 accumulate) -> loose tolerance vs f32 reference.
        assert jnp.allclose(out[k], ref[k], atol=1e-2, rtol=2e-2), k

    # TODO(synk): sample_actions / evaluate_actions (Normal sampling, tanh
    # squashing, log-prob / entropy math) are not part of forward() and are
    # left to plain JAX.
    print("KERNEL_OK")
</pallas_src>

<mosaic_0001>
module attributes {stable_mosaic.version = 11 : i64} {
  func.func @_actor_head_kernel(%arg0: i32, %arg1: i32, %arg2: memref<1x8x32xf32, #tpu.memory_space<vmem>>, %arg3: memref<1x1x128xf32, #tpu.memory_space<vmem>>, %arg4: memref<32x128xbf16, #tpu.memory_space<vmem>>, %arg5: memref<128x128xbf16, #tpu.memory_space<vmem>>, %arg6: memref<1x128xf32, #tpu.memory_space<vmem>>, %arg7: memref<128x128xbf16, #tpu.memory_space<vmem>>, %arg8: memref<1x128xf32, #tpu.memory_space<vmem>>, %arg9: memref<1x8x4xf32, #tpu.memory_space<vmem>>) attributes {dimension_semantics = [#tpu.dimension_semantics<parallel>, #tpu.dimension_semantics<parallel>], iteration_bounds = array<i64: 2, 1>, scalar_prefetch = 0 : i64, scratch_operands = 0 : i64, tpu.core_type = #tpu.core_type<tc>, window_params = [{transform_indices = @transform_0, window_bounds = array<i64: 1, 8, 32>}, {transform_indices = @transform_1, window_bounds = array<i64: 1, 1, 128>}, {pipeline_mode = #tpu.pipeline_mode<synchronous>, transform_indices = @transform_2, window_bounds = array<i64: 32, 128>}, {pipeline_mode = #tpu.pipeline_mode<synchronous>, transform_indices = @transform_3, window_bounds = array<i64: 128, 128>}, {pipeline_mode = #tpu.pipeline_mode<synchronous>, transform_indices = @transform_4, window_bounds = array<i64: 1, 128>}, {pipeline_mode = #tpu.pipeline_mode<synchronous>, transform_indices = @transform_5, window_bounds = array<i64: 128, 128>}, {pipeline_mode = #tpu.pipeline_mode<synchronous>, transform_indices = @transform_6, window_bounds = array<i64: 1, 128>}, {transform_indices = @transform_7, window_bounds = array<i64: 1, 8, 4>}]} {
    %c0 = arith.constant 0 : index
    %c0_0 = arith.constant 0 : index
    %c0_1 = arith.constant 0 : index
    %0 = vector.load %arg2[%c0, %c0_0, %c0_1] : memref<1x8x32xf32, #tpu.memory_space<vmem>>, vector<1x8x32xf32>
    %1 = vector.shape_cast %0 : vector<1x8x32xf32> to vector<8x32xf32>
    %2 = arith.truncf %1 : vector<8x32xf32> to vector<8x32xbf16>
    %c0_2 = arith.constant 0 : index
    %c0_3 = arith.constant 0 : index
    %3 = vector.load %arg4[%c0_2, %c0_3] : memref<32x128xbf16, #tpu.memory_space<vmem>>, vector<32x128xbf16>
    %cst = arith.constant dense<0.000000e+00> : vector<8x128xf32>
    %4 = tpu.matmul %2, %3, %cst {dimension_numbers = #tpu.dot_dimension_numbers<[1], [0], [0], [1], [0, 0, 1, 1], [], []>} : vector<8x32xbf16>, vector<32x128xbf16>, vector<8x128xf32> -> vector<8x128xf32>
    %5 = vector.shape_cast %4 : vector<8x128xf32> to vector<1x8x128xf32>
    %c0_4 = arith.constant 0 : index
    %c0_5 = arith.constant 0 : index
    %c0_6 = arith.constant 0 : index
    %6 = vector.load %arg3[%c0_4, %c0_5, %c0_6] : memref<1x1x128xf32, #tpu.memory_space<vmem>>, vector<1x1x128xf32>
    %7 = vector.broadcast %6 : vector<1x1x128xf32> to vector<1x8x128xf32>
    %8 = arith.addf %5, %7 : vector<1x8x128xf32>
    %cst_7 = arith.constant 0.000000e+00 : f32
    %9 = vector.broadcast %cst_7 : f32 to vector<1x8x128xf32>
    %10 = arith.maximumf %8, %9 : vector<1x8x128xf32>
    %11 = vector.shape_cast %10 : vector<1x8x128xf32> to vector<8x128xf32>
    %12 = arith.truncf %11 : vector<8x128xf32> to vector<8x128xbf16>
    %c0_8 = arith.constant 0 : index
    %c0_9 = arith.constant 0 : index
    %13 = vector.load %arg5[%c0_8, %c0_9] : memref<128x128xbf16, #tpu.memory_space<vmem>>, vector<128x128xbf16>
    %cst_10 = arith.constant dense<0.000000e+00> : vector<8x128xf32>
    %14 = tpu.matmul %12, %13, %cst_10 {dimension_numbers = #tpu.dot_dimension_numbers<[1], [0], [0], [1], [0, 0, 1, 1], [], []>} : vector<8x128xbf16>, vector<128x128xbf16>, vector<8x128xf32> -> vector<8x128xf32>
    %c0_11 = arith.constant 0 : index
    %c0_12 = arith.constant 0 : index
    %15 = vector.load %arg6[%c0_11, %c0_12] : memref<1x128xf32, #tpu.memory_space<vmem>>, vector<1x128xf32>
    %16 = vector.broadcast %15 : vector<1x128xf32> to vector<8x128xf32>
    %17 = arith.addf %14, %16 : vector<8x128xf32>
    %cst_13 = arith.constant 0.000000e+00 : f32
    %18 = vector.broadcast %cst_13 : f32 to vector<8x128xf32>
    %19 = arith.maximumf %17, %18 : vector<8x128xf32>
    %20 = arith.truncf %19 : vector<8x128xf32> to vector<8x128xbf16>
    %c0_14 = arith.constant 0 : index
    %c0_15 = arith.constant 0 : index
    %21 = vector.load %arg7[%c0_14, %c0_15] : memref<128x128xbf16, #tpu.memory_space<vmem>>, vector<128x128xbf16>
    %cst_16 = arith.constant dense<0.000000e+00> : vector<8x128xf32>
    %22 = tpu.matmul %20, %21, %cst_16 {dimension_numbers = #tpu.dot_dimension_numbers<[1], [0], [0], [1], [0, 0, 1, 1], [], []>} : vector<8x128xbf16>, vector<128x128xbf16>, vector<8x128xf32> -> vector<8x128xf32>
    %c0_17 = arith.constant 0 : index
    %c0_18 = arith.constant 0 : index
    %23 = vector.load %arg8[%c0_17, %c0_18] : memref<1x128xf32, #tpu.memory_space<vmem>>, vector<1x128xf32>
    %24 = vector.broadcast %23 : vector<1x128xf32> to vector<8x128xf32>
    %25 = arith.addf %22, %24 : vector<8x128xf32>
    %26 = tpu.iota {dimensions = array<i32: 1>} : vector<8x128xi32>
    %c2_i32 = arith.constant 2 : i32
    %27 = vector.broadcast %c2_i32 : i32 to vector<8x128xi32>
    %28 = arith.cmpi slt, %26, %27 : vector<8x128xi32>
    %cst_19 = arith.constant -2.000000e+01 : f32
    %cst_20 = arith.constant 2.000000e+00 : f32
    %29 = vector.broadcast %cst_19 : f32 to vector<8x128xf32>
    %30 = arith.maximumf %29, %25 : vector<8x128xf32>
    %31 = vector.broadcast %cst_20 : f32 to vector<8x128xf32>
    %32 = arith.minimumf %31, %30 : vector<8x128xf32>
    %33 = arith.select %28, %25, %32 : vector<8x128xi1>, vector<8x128xf32>
    %34 = vector.extract_strided_slice %33 {offsets = [0, 0], sizes = [8, 4], strides = [1, 1]} : vector<8x128xf32> to vector<8x4xf32>
    %35 = vector.shape_cast %34 : vector<8x4xf32> to vector<1x8x4xf32>
    %c0_21 = arith.constant 0 : index
    %c0_22 = arith.constant 0 : index
    %c0_23 = arith.constant 0 : index
    %36 = vector.load %arg9[%c0_21, %c0_22, %c0_23] : memref<1x8x4xf32, #tpu.memory_space<vmem>>, vector<1x8x4xf32>
    tpu.vector_store %arg9[%c0_21, %c0_22, %c0_23], %35 {strides = array<i32>} : memref<1x8x4xf32, #tpu.memory_space<vmem>>, vector<1x8x4xf32>,
    return
  }
  func.func @transform_0(%arg0: i32, %arg1: i32) -> (i32, i32, i32) {
    %c0_i32 = arith.constant 0 : i32
    %c0_i32_0 = arith.constant 0 : i32
    return %arg0, %arg1, %c0_i32 : i32, i32, i32
  }
  func.func @transform_1(%arg0: i32, %arg1: i32) -> (i32, i32, i32) {
    %c0_i32 = arith.constant 0 : i32
    %c0_i32_0 = arith.constant 0 : i32
    %c0_i32_1 = arith.constant 0 : i32
    return %arg0, %c0_i32, %c0_i32_0 : i32, i32, i32
  }
  func.func @transform_2(%arg0: i32, %arg1: i32) -> (i32, i32) {
    %c0_i32 = arith.constant 0 : i32
    %c0_i32_0 = arith.constant 0 : i32
    %c0_i32_1 = arith.constant 0 : i32
    return %c0_i32, %c0_i32_0 : i32, i32
  }
  func.func @transform_3(%arg0: i32, %arg1: i32) -> (i32, i32) {
    %c0_i32 = arith.constant 0 : i32
    %c0_i32_0 = arith.constant 0 : i32
    %c0_i32_1 = arith.constant 0 : i32
    return %c0_i32, %c0_i32_0 : i32, i32
  }
  func.func @transform_4(%arg0: i32, %arg1: i32) -> (i32, i32) {
    %c0_i32 = arith.constant 0 : i32
    %c0_i32_0 = arith.constant 0 : i32
    %c0_i32_1 = arith.constant 0 : i32
    return %c0_i32, %c0_i32_0 : i32, i32
  }
  func.func @transform_5(%arg0: i32, %arg1: i32) -> (i32, i32) {
    %c0_i32 = arith.constant 0 : i32
    %c0_i32_0 = arith.constant 0 : i32
    %c0_i32_1 = arith.constant 0 : i32
    return %c0_i32, %c0_i32_0 : i32, i32
  }
  func.func @transform_6(%arg0: i32, %arg1: i32) -> (i32, i32) {
    %c0_i32 = arith.constant 0 : i32
    %c0_i32_0 = arith.constant 0 : i32
    %c0_i32_1 = arith.constant 0 : i32
    return %c0_i32, %c0_i32_0 : i32, i32
  }
  func.func @transform_7(%arg0: i32, %arg1: i32) -> (i32, i32, i32) {
    %c0_i32 = arith.constant 0 : i32
    %c0_i32_0 = arith.constant 0 : i32
    return %arg0, %arg1, %c0_i32 : i32, i32, i32
  }
}

</mosaic_0001>

<bundles_post_ra>
// kernel: actor_head_forward.1
= control target key start
LH: loop header
LB: loop body
LE: loop exit
PB: predicated region body
PF: predicated region fallthrough
CT: control target
= control target key end

     0   :  { %12 = vsyncpa [#allocation3], 0  ;;  %s1421_s0 = inlined_call_operand.hbm [shape: f32[2,8,32], index: 0, kind: input, shape index: {}]   ;;  %s1422_s1 = inlined_call_operand.vmem [shape: f32[2,1,128], index: 1, kind: input, shape index: {}]   ;;  %s1423_s2 = inlined_call_operand.hbm [shape: bf16[32,128], index: 2, kind: input, shape index: {}]   ;;  %s1424_s3 = inlined_call_operand.vmem [shape: bf16[128,128], index: 3, kind: input, shape index: {}]   ;;  %s1425_s4 = inlined_call_operand.vmem [shape: f32[1,128], index: 4, kind: input, shape index: {}]   ;;  %s1426_s5 = inlined_call_operand.hbm [shape: bf16[128,128], index: 5, kind: input, shape index: {}]   ;;  %s1427_s6 = inlined_call_operand.vmem [shape: f32[1,128], index: 6, kind: input, shape index: {}]   ;;  %s1428_s7 = inlined_call_operand.vmem [shape: f32[2,8,4], index: 7, kind: output, shape index: {}]  }
   0x1   :  { %14 = vsyncpa [#allocation3 + $0x1], 0 }
   0x2   :  { %15 = vsyncpa [#allocation5], 0  ;;  %s1170_s24 = smov 0   ;;  %s1172_s25 = smov 0  }
   0x3   :  { %s1174_s26 = smov 0   ;;  %s1176_s27 = smov 0  }
   0x4   :  { %s1178_s28 = smov 0   ;;  %s1180_s29 = smov 0  }
   0x5 LB: > { %s777_s30 = sadd.s32 4294967295, %s1121_s29   ;;  %p55_p0 = scmp.ne.s32.totalorder %s1105_s25, %s1101_s24  ;;  %s1121_s29 = sphi %s1180_s29, %s21_s29   ;;  %s1117_s28 = sphi %s1178_s28, %s1445_s28   ;;  %s1113_s27 = sphi %s1176_s27, %s1444_s27   ;;  %s1109_s26 = sphi %s1174_s26, %s1443_s26   ;;  %s1105_s25 = sphi %s1172_s25, %s1442_s25   ;;  %s1101_s24 = sphi %s1170_s24, %s1441_s24  }
   0x6   : > { %p1200_p1 = scmp.eq.s32.totalorder %s777_s30, 0  ;;  %p779_p2 = scmp.ge.s32.totalorder %s1121_s29, 1 }
   0x7   : > { %p225_p3 = scmp.lt.s32.totalorder %s1121_s29, 3  ;;  %s1123_s11 = smov [#allocation4]  }
   0x8   : > { %s1433_s8 = scalar_select %p1200_p1, 1, 0 }
   0x9   : > { %p1208_p4 = por %p1200_p1, %p55_p0  ;;  %p1212_p5 = pnand %p779_p2, %p225_p3 }
   0xa   : > { %s237_s12 = sshll.u32 %s1123_s11, 4  ;;  %s1124_s14 = smov [#allocation6]   ;;  %s238_s12 = int_to_ptr.vmem [resolvable:$true] %s237_s12 }
   0xb   : > { %s1434_s9 = scalar_select %p1208_p4, 1, 0 }
   0xc   : > { %s1435_s10 = scalar_select %p1212_p5, 1, 0 }
   0xd   : > { %p893_p6 = pneg %p1212_p5  ;;  %s256_s15 = sshll.u32 %s1124_s14, 4  ;;  %s1224_s15 = int_to_ptr.vmem [resolvable:$true] %s256_s15 }
   0xe   : > { %s981_s18 = scalar_lea.hbm %s1423_s2, 256 }
   0xf   : > { %p1220_p7 = pnand %p893_p6, %p1200_p1  ;;  %p982_p8 = scmp.ne.s32.totalorder %s1423_s2, %s981_s18 }
  0x10   : > { %p988_p12 = scmp.lt.u32.totalorder %s981_s18, %s1423_s2 }
  0x11   : > { %p983_p9 = pneg %p1220_p7 }
  0x13   : > { %p984_p10 = pnand %p983_p9, %p982_p8 }
  0x15   : > { %p985_p11 = pneg %p984_p10 }
  0x17   : > { %p990_p13 = pnand %p988_p12, %p985_p11 }
  0x19   : > { %993 = shalt.err (!%p990_p13)
}
  0x1a   : > { %s994_s23 = scalar_lea.vmem %s238_s12, 256  ;;  %p1002_p6 = scmp.lt.s32.totalorder %s238_s12, %s238_s12 }
  0x1b   : > { %p995_p0 = scmp.ne.s32.totalorder %s238_s12, %s994_s23  ;;  %p1003_p1 = scmp.lt.s32.totalorder %s994_s23, %s994_s23 }
  0x1d   : > { %p997_p2 = pnand %p995_p0, %p983_p9  ;;  %p1004_p4 = por %p1003_p1, %p1002_p6 }
  0x1f   : > { %p998_p3 = pneg %p997_p2 }
  0x21   : > { %p1005_p5 = pnand %p1004_p4, %p998_p3 }
  0x23   : > { %1008 = shalt.err (!%p1005_p5)
}
  0x24   : > { %s1125_s24 = smov 64   ;;  %s1126_s30 = smov 4  }
  0x25   : > { %896 = dma.hbm_to_vmem [thread:$0]  (!%p1220_p7), %s1423_s2, 256, %s238_s12, [#allocation5], %s1125_s24, %s1125_s24, %s1126_s30  }
  0x26   : > { %s1009_s18 = scalar_lea.hbm %s1426_s5, 1024 }
  0x27   : > { %p1010_p8 = scmp.ne.s32.totalorder %s1426_s5, %s1009_s18  ;;  %p1016_p5 = scmp.lt.u32.totalorder %s1009_s18, %s1426_s5 }
  0x29   : > { %p1012_p1 = pnand %p1010_p8, %p983_p9 }
  0x2b   : > { %p1013_p4 = pneg %p1012_p1 }
  0x2d   : > { %p1018_p10 = pnand %p1016_p5, %p1013_p4 }
  0x2f   : > { %1021 = shalt.err (!%p1018_p10)
}
  0x30   : > { %s1022_s12 = scalar_lea.vmem %s1224_s15, 1024  ;;  %p1030_p0 = scmp.lt.s32.totalorder %s1224_s15, %s1224_s15 }
  0x31   : > { %p1023_p11 = scmp.ne.s32.totalorder %s1224_s15, %s1022_s12  ;;  %p1031_p2 = scmp.lt.s32.totalorder %s1022_s12, %s1022_s12 }
  0x33   : > { %p1025_p12 = pnand %p1023_p11, %p983_p9  ;;  %p1032_p3 = por %p1031_p2, %p1030_p0 }
  0x35   : > { %p1026_p13 = pneg %p1025_p12 }
  0x37   : > { %p1033_p6 = pnand %p1032_p3, %p1026_p13 }
  0x39   : > { %1036 = shalt.err (!%p1033_p6)
}
  0x3a   : > { %899 = dma.hbm_to_vmem [thread:$0]  (!%p1220_p7), %s1426_s5, 1024, %s1224_s15, [#allocation5], %s1125_s24, %s1125_s24, %s1126_s30  }
  0x3b   : > { %s33_s14 = sadd.s32 1, %s1117_s28  ;;  %s42_s16 = sadd.s32 1, %s1109_s26 }
  0x3c   : > { %p35_p9 = scmp.ge.s32.totalorder %s33_s14, 2  ;;  %p49_p8 = scmp.ne.s32.totalorder %s1109_s26, %s1105_s25 }
  0x3d   : > { %p50_p1 = scmp.eq.s32.totalorder %s1121_s29, 0  ;;  %p906_p4 = scmp.lt.s32.totalorder %s1121_s29, 2 }
  0x3e   : > { %s1447_s14 = smov (%p35_p9, %s33_s14), 0  ;;  %s273_s13 = sand.u32 1, %s1109_s26  }
  0x3f   : > { %p51_p5 = por %p50_p1, %p49_p8  ;;  %s37_s17 = ssub.s32 %s1117_s28, %s1447_s14 }
  0x40   : > { %p40_p10 = scmp.eq.s32.totalorder %s37_s17, 0  ;;  %s783_s18 = sshll.u32 %s273_s13, 3 }
  0x41   : > { %s784_s19 = sshll.u32 %s1117_s28, 7  ;;  %s277_s30 = scalar_lea.vmem [#allocation2], %s783_s18 }
  0x42   : > { %s1286_s20 = scalar_select %p40_p10, %s1109_s26, %s42_s16  }
  0x43   : > { %s1291_s24 = scalar_lea.hbm %s1421_s0, %s784_s19  ;;  %s285_s22 = sshll.u32 %s277_s30, 4  ;;  %s1293_s22 = int_to_ptr.vmem [resolvable:$true] %s285_s22 }
  0x44   : > { %p1297_p7 = pnand %p906_p4, %p51_p5  ;;  %s274_s23 = scalar_lea.sflag [#allocation3], %s273_s13 }
  0x45   : > { %s1037_s11 = scalar_lea.hbm %s1291_s24, 128  ;;  %s1042_s18 = scalar_lea.hbm %s1421_s0, 256 }
  0x46   : > { %p1038_p11 = scmp.ne.s32.totalorder %s1291_s24, %s1037_s11  ;;  %p1039_p12 = pneg %p1297_p7 }
  0x47   : > { %p1043_p2 = scmp.lt.u32.totalorder %s1291_s24, %s1421_s0  ;;  %p1044_p3 = scmp.lt.u32.totalorder %s1042_s18, %s1037_s11 }
  0x48   : > { %p1040_p13 = pnand %p1039_p12, %p1038_p11  ;;  %p1046_p9 = scmp.lt.u32.totalorder %s1037_s11, %s1291_s24 }
  0x49   : > { %p1045_p6 = por %p1044_p3, %p1043_p2 }
  0x4a   : > { %p1041_p0 = pneg %p1040_p13 }
  0x4b   : > { %p1047_p8 = por %p1046_p9, %p1045_p6 }
  0x4d   : > { %p1048_p1 = pnand %p1047_p8, %p1041_p0 }
  0x4f   : > { %1051 = shalt.err (!%p1048_p1)
}
  0x50   : > { %s1052_s13 = scalar_lea.vmem %s1293_s22, 128  ;;  %s1127_s15 = smov [#allocation2]  }
  0x51   : > { %p1053_p4 = scmp.ne.s32.totalorder %s1293_s22, %s1052_s13  ;;  %s1057_s30 = sshll.u32 %s1127_s15, 4  ;;  %s1058_s30 = int_to_ptr.vmem [resolvable:$false] %s1057_s30 }
  0x52   : > { %s1059_s16 = scalar_lea.vmem %s1058_s30, 256  ;;  %p1060_p11 = scmp.lt.s32.totalorder %s1293_s22, %s1058_s30 }
  0x53   : > { %p1055_p5 = pnand %p1053_p4, %p1039_p12  ;;  %p1061_p13 = scmp.lt.s32.totalorder %s1059_s16, %s1052_s13 }
  0x55   : > { %p1056_p10 = pneg %p1055_p5  ;;  %p1062_p2 = por %p1061_p13, %p1060_p11 }
  0x57   : > { %p1063_p3 = pnand %p1062_p2, %p1056_p10 }
  0x59   : > { %1066 = shalt.err (!%p1063_p3)
}
  0x5a   : > { %903 = dma.hbm_to_vmem [thread:$0]  (!%p1297_p7), %s1291_s24, 128, %s1293_s22, %s274_s23  }
  0x5b   : > { %p1438_p0 = scmp.ne.s32.totalorder %s1435_s10, 0 }
  0x5c   : > { %s302_s11 = sand.u32 (!%p1438_p0), 1, %s1105_s25   ;;  %p1439_p12 = scmp.ne.s32.totalorder (!%p1438_p0), %s1434_s9, 0 }
  0x5d   : > { %300 = sbr.rel (%p1438_p0) target bundleno = 770 (0x302), region = 48  ;;  %s786_s17 = sshll.u32 (!%p1438_p0), %s302_s11, 3 }
  0x5e   : > { %s303_s18 = scalar_lea.sflag (!%p1438_p0), [#allocation3], %s302_s11  ;;  %s306_s19 = scalar_lea.vmem (!%p1438_p0), [#allocation2], %s786_s17 }
  0x64   : > { %1092 = dma.done.wait (%p1439_p12), %s303_s18, 128  }
  0x65   : > { %1094 = vsyncadd (%p1439_p12), %s303_s18, 4294967168  ;;  %p1440_p6 = scmp.ne.s32.totalorder %s1433_s8, 0 }
  0x67   : > { %1096 = dma.done.wait (%p1440_p6), [#allocation5], 1280  }
  0x68   : > { %1098 = vsyncadd (%p1440_p6), [#allocation5], 4294966016  ;;  %v1128_v0 = vmov 0.0   ;;  %vm1129_vm0 = vmmov 0   ;;  %v963_v1 = vld [vmem:[#allocation4] sm:$0xff]   ;;  %v964_v2 = vld [vmem:[#allocation4 + $0x8] sm:$0xff]   ;;  %v657_v37 = vlaneseq }
  0x69   : > { %835 = vmatprep.subr.bf16.mxu0 %v1128_v0  ;;  %839 = vmatprep.mubr.msk.bf16.mxu0 %vm1129_vm0, %v1128_v0  ;;  %v361_v3 = vld [vmem:[%s306_s19] sm:$0xff]  ;;  %vm379_vm1 = vcmask 261120   ;;  %v967_v7 = vld [vmem:[%s1424_s3 + $0x10] sm:$0xff]   ;;  %v968_v8 = vld [vmem:[%s1424_s3 + $0x18] sm:$0xff]   ;;  %p350_p7 = scmp.lt.s32.totalorder %s1113_s27, 1  ;;  %vm663_vm3 = vcmask 31744  }
  0x6a   : > { %843 = vmatprep.subr.bf16.mxu1 %v1128_v0  ;;  %859 = vmatprep.mubr.msk.bf16.mxu1 %vm1129_vm0, %v1128_v0  ;;  %v965_v4 = vld [vmem:[%s1424_s3] sm:$0xff]   ;;  %v362_v5 = vpack.c.bf16 %v361_v3, %v361_v3  ;;  %v966_v6 = vld [vmem:[%s1424_s3 + $0x8] sm:$0xff]   ;;  %v971_v11 = vld [vmem:[%s1424_s3 + $0x30] sm:$0xff]   ;;  %v658_v40 = vand.u32 127, %v657_v37 }
  0x6b   : > { %836 = vmatpush3.bf16.msra.mxu0 %v963_v1  ;;  %844 = vmatpush3.bf16.msra.mxu1 %v965_v4  ;;  %v969_v9 = vld [vmem:[%s1424_s3 + $0x20] sm:$0xff]   ;;  %v970_v10 = vld [vmem:[%s1424_s3 + $0x28] sm:$0xff]   ;;  %v972_v12 = vld [vmem:[%s1424_s3 + $0x38] sm:$0xff]   ;;  %s1449_s27 = smov (!%p350_p7, %s1113_s27), 1 }
  0x6c   : > { %837 = vmatprep.subr.bf16.mxu0 %v1128_v0  ;;  %845 = vmatprep.subr.bf16.mxu1 %v1128_v0  ;;  %v973_v13 = vld [vmem:[#allocation6] sm:$0xff]   ;;  %v974_v14 = vld [vmem:[#allocation6 + $0x8] sm:$0xff]   ;;  %v975_v15 = vld [vmem:[#allocation6 + $0x10] sm:$0xff]   ;;  %s352_s10 = scalar_lea.vmem %s1422_s1, %s1449_s27  ;;  %s789_s21 = sshll.u32 %s1449_s27, 3  ;;  %vm659_vm2 = vcmp.lt.s32.totalorder %v658_v40, 2 }
  0x6d   : > { %v976_v16 = vld [vmem:[#allocation6 + $0x18] sm:$0xff]   ;;  %v977_v17 = vld [vmem:[#allocation6 + $0x20] sm:$0xff]   ;;  %v978_v18 = vld [vmem:[#allocation6 + $0x28] sm:$0xff]   ;;  %s359_s30 = scalar_lea.vmem %s1428_s7, %s789_s21 }
  0x6e   : > { %v793_v19 = vld [vmem:[%s352_s10] ss:$0 sm:$0xff]  ;;  %v979_v27 = vld [vmem:[#allocation6 + $0x30] sm:$0xff]   ;;  %v980_v28 = vld [vmem:[#allocation6 + $0x38] sm:$0xff]  }
  0x6f   : > { %838 = vmatpush3.bf16.msra.mxu0 %v964_v2  ;;  %846 = vmatpush3.bf16.msra.mxu1 %v966_v6  ;;  %v794_v29 = vld [vmem:[%s1425_s4] ss:$0 sm:$0xff] }
  0x70   : > { %863 = vmatprep.subr.bf16.mxu0 %v1128_v0  ;;  %847 = vmatprep.subr.bf16.mxu1 %v1128_v0  ;;  %v803_v38 = vld [vmem:[%s1427_s6] ss:$0 sm:$0xff] }
  0x72   : > { %840 = vmatmul.mubr.msk.bf16.vlgmr.msra.gmra.mrb[0].mxu0 %vm379_vm1, %v362_v5 }
  0x73   : > { %879 = vmatprep.mubr.msk.bf16.mxu0 %vm1129_vm0, %v1128_v0  ;;  %848 = vmatpush3.bf16.msra.mxu1 %v967_v7 }
  0x74   : > { %849 = vmatprep.subr.bf16.mxu1 %v1128_v0  ;;  %864 = vmatpush3.bf16.msra.mxu0 %v973_v13 }
  0x75   : > { %865 = vmatprep.subr.bf16.mxu0 %v1128_v0 }
  0x77   : > { %850 = vmatpush3.bf16.msra.mxu1 %v968_v8 }
  0x78   : > { %851 = vmatprep.subr.bf16.mxu1 %v1128_v0  ;;  %866 = vmatpush3.bf16.msra.mxu0 %v974_v14 }
  0x79   : > { %867 = vmatprep.subr.bf16.mxu0 %v1128_v0 }
  0x7b   : > { %852 = vmatpush3.bf16.msra.mxu1 %v969_v9 }
  0x7c   : > { %853 = vmatprep.subr.bf16.mxu1 %v1128_v0  ;;  %868 = vmatpush3.bf16.msra.mxu0 %v975_v15 }
  0x7d   : > { %869 = vmatprep.subr.bf16.mxu0 %v1128_v0 }
  0x7f   : > { %854 = vmatpush3.bf16.msra.mxu1 %v970_v10 }
  0x80   : > { %855 = vmatprep.subr.bf16.mxu1 %v1128_v0  ;;  %870 = vmatpush3.bf16.msra.mxu0 %v976_v16 }
  0x81   : > { %871 = vmatprep.subr.bf16.mxu0 %v1128_v0 }
  0x83   : > { %856 = vmatpush3.bf16.msra.mxu1 %v971_v11 }
  0x84   : > { %857 = vmatprep.subr.bf16.mxu1 %v1128_v0  ;;  %872 = vmatpush3.bf16.msra.mxu0 %v977_v17 }
  0x85   : > { %873 = vmatprep.subr.bf16.mxu0 %v1128_v0 }
  0x87   : > { %858 = vmatpush3.bf16.msra.mxu1 %v972_v12 }
  0x88   : > { %874 = vmatpush3.bf16.msra.mxu0 %v978_v18 }
  0x89   : > { %875 = vmatprep.subr.bf16.mxu0 %v1128_v0 }
  0x8c   : > { %876 = vmatpush3.bf16.msra.mxu0 %v979_v27 }
  0x8d   : > { %877 = vmatprep.subr.bf16.mxu0 %v1128_v0 }
  0x90   : > { %878 = vmatpush3.bf16.msra.mxu0 %v980_v28 }
 0x145   : > { %v417_v20 = vpop.f32.mrb[0].mxu0 }
 0x146   : > { %v430_v21 = vadd.f32 %v793_v19, %v417_v20  ;;  %v841_v22 = vpop.f32.mrb[1].mxu0 }
 0x147   : > { %v420_v23 = vpop.f32.mrb[2].mxu0 }
 0x148   : > { %v431_v24 = vmax.f32 %v430_v21, 0.0  ;;  %v842_v25 = vpop.f32.mrb[3].mxu0 }
 0x14a   : > { %v432_v26 = vpack.c.bf16 %v431_v24, %v431_v24 }
 0x14c   : > { %860 = vmatmul.mubr.bf16.vlgmr.msra.gmra.mrb[0].mxu1 %v432_v26 }
 0x21f   : > { %v538_v30 = vpop.f32.mrb[0].mxu1 }
 0x220   : > { %v539_v31 = vadd.f32 %v794_v29, %v538_v30  ;;  %v861_v32 = vpop.f32.mrb[1].mxu1 }
 0x221   : > { %v541_v33 = vpop.f32.mrb[2].mxu1 }
 0x222   : > { %v544_v34 = vmax.f32 %v539_v31, 0.0  ;;  %v862_v35 = vpop.f32.mrb[3].mxu1 }
 0x224   : > { %v545_v36 = vpack.c.bf16 %v544_v34, %v544_v34 }
 0x226   : > { %880 = vmatmul.mubr.bf16.vlgmr.msra.gmra.mrb[4].mxu0 %v545_v36 }
 0x2f9   : > { %v651_v39 = vpop.f32.mrb[4].mxu0 }
 0x2fa   : > { %v652_v41 = vadd.f32 %v803_v38, %v651_v39  ;;  %v881_v42 = vpop.f32.mrb[5].mxu0 }
 0x2fb   : > { %v654_v43 = vpop.f32.mrb[6].mxu0 }
 0x2fc   : > { %v660_v44 = vmax.f32 %v652_v41, -20.0  ;;  %v882_v45 = vpop.f32.mrb[7].mxu0 }
 0x2fe   : > { %v661_v46 = vmin.f32 %v660_v44, 2.0 }
 0x300   : > { %v662_v47 = vsel %vm659_vm2, %v652_v41, %v661_v46 }
 0x301   : > { %664 = vst.msk [vmem:[%s359_s30] sm:$0xff] %vm663_vm3, %v662_v47 }
 0x302 PF: > { %s21_s29 = sadd.s32 1, %s1121_s29   ;;  %s1441_s24 = smov %s1105_s25 }
 0x303   : > { %p18_p9 = scmp.ge.s32.totalorder %s21_s29, 4   ;;  %s1442_s25 = smov %s1109_s26 }
 0x304   : > { %s1443_s26 = smov %s1286_s20  ;;  %s1444_s27 = smov %s1117_s28 }
 0x305   : > { %s1445_s28 = smov %s1447_s14  ;;  %20 = sbr.rel (!%p18_p9) target bundleno = 5 (0x5), region = 99 }
 0x30c   :  { %690 = vsyncpa [#allocation3], 1 }
 0x30d   :  { %692 = vsyncpa [#allocation3 + $0x1], 1 }
 0x30e   :  { %693 = vsyncpa [#allocation5], 1 }

</bundles_post_ra>
